<compile_context>
chip_gen: v7x
topology: tpu7x:2x2x1
jax: 0.10.0
libtpu: 0.0.40
codegen_flags: <defaults>
</compile_context>

<pallas_src>
import functools
import math

import jax
import jax.numpy as jnp
from jax import lax
from jax.experimental import pallas as pl
from jax.experimental.pallas import tpu as pltpu


# ----------------------------- in-kernel helpers -----------------------------

def _layernorm(x, gamma, beta, eps=1e-12):
    mu = jnp.mean(x, axis=-1, keepdims=True)
    var = jnp.mean(jnp.square(x - mu), axis=-1, keepdims=True)
    return (x - mu) * lax.rsqrt(var + eps) * gamma + beta


def _gelu_tanh(y):
    return 0.5 * y * (1.0 + jnp.tanh(0.7978845608028654 * (y + 0.044715 * y * y * y)))


# ----------------------------- Pallas kernels -----------------------------

def _embed_pos_ln_kernel(ids_ref, tbl_ref, pos_ref, g_ref, b_ref, o_ref, xs_ref):
    # Gather word-embedding rows (token ids live in SMEM), add position
    # embeddings and apply the embedding LayerNorm — all in one kernel.
    n_tok = xs_ref.shape[0]
    for i in range(n_tok):                       # static unroll, small B*S
        row = ids_ref[i]                         # scalar from SMEM
        xs_ref[pl.ds(i, 1), :] = tbl_ref[pl.ds(row, 1), :]
    x = xs_ref[...] + pos_ref[...]
    o_ref[...] = _layernorm(x, g_ref[...], b_ref[...])


def _pos_ln_kernel(x_ref, pos_ref, g_ref, b_ref, o_ref):
    # inputs_embeds path: skip the gather, still add positions + LayerNorm.
    o_ref[...] = _layernorm(x_ref[...] + pos_ref[...], g_ref[...], b_ref[...])


def _linear_kernel(x_ref, w_ref, b_ref, o_ref, acc_ref, *, activation):
    # Tiled matmul with VMEM f32 accumulator; bias (+ optional GELU) epilogue.
    k = pl.program_id(2)

    @pl.when(k == 0)
    def _():
        acc_ref[...] = jnp.zeros_like(acc_ref)

    acc_ref[...] += jnp.dot(x_ref[...], w_ref[...],
                            preferred_element_type=jnp.float32)

    @pl.when(k == pl.num_programs(2) - 1)
    def _():
        y = acc_ref[...] + b_ref[...]
        if activation == "gelu":
            y = _gelu_tanh(y)
        o_ref[...] = y


def _linear_res_ln_kernel(x_ref, w_ref, b_ref, res_ref, g_ref, beta_ref,
                          o_ref, acc_ref):
    # Tiled matmul fused with bias + residual add + LayerNorm epilogue.
    # (requires tn == full hidden dim so the row statistics are complete)
    k = pl.program_id(2)

    @pl.when(k == 0)
    def _():
        acc_ref[...] = jnp.zeros_like(acc_ref)

    acc_ref[...] += jnp.dot(x_ref[...], w_ref[...],
                            preferred_element_type=jnp.float32)

    @pl.when(k == pl.num_programs(2) - 1)
    def _():
        y = acc_ref[...] + b_ref[...] + res_ref[...]
        o_ref[...] = _layernorm(y, g_ref[...], beta_ref[...])


def _attention_kernel(qkv_ref, mask_ref, alpha_ref, o_ref, *,
                      num_heads, head_dim, scale):
    # One batch element per grid step.  The MaskedTextClassifier mask-combine
    # (attention_mask * alpha) is fused in here; nonzero => attend.
    d_model = num_heads * head_dim
    qkv = qkv_ref[0]                                  # (S, 3*D)
    m = mask_ref[0] * alpha_ref[0]                    # (1, S) float32
    bias = jnp.where(m > 0.5, 0.0, -1e9)              # additive key bias
    outs = []
    for h in range(num_heads):                        # static unroll
        q = qkv[:, h * head_dim:(h + 1) * head_dim]
        k = qkv[:, d_model + h * head_dim:d_model + (h + 1) * head_dim]
        v = qkv[:, 2 * d_model + h * head_dim:2 * d_model + (h + 1) * head_dim]
        s = lax.dot_general(q, k, (((1,), (1,)), ((), ())),
                            preferred_element_type=jnp.float32) * scale + bias
        s_max = jnp.max(s, axis=-1, keepdims=True)
        p = jnp.exp(s - s_max)
        denom = jnp.sum(p, axis=-1, keepdims=True)
        p = p * pl.reciprocal(denom, approx=True)
        outs.append(jnp.dot(p, v, preferred_element_type=jnp.float32))
    o_ref[0] = jnp.concatenate(outs, axis=-1)         # single 128-lane store


def _pool_classify_kernel(cls_ref, wp_ref, bp_ref, wc_ref, bc_ref, o_ref):
    # tanh pooler over the CLS hidden state, then (zero-padded) classifier.
    pooled = jnp.tanh(jnp.dot(cls_ref[...], wp_ref[...],
                              preferred_element_type=jnp.float32) + bp_ref[...])
    o_ref[...] = jnp.dot(pooled, wc_ref[...],
                         preferred_element_type=jnp.float32) + bc_ref[...]


# ----------------------------- Pallas wrappers -----------------------------

_VMEM_LIMIT = 32 * 1024 * 1024
_vmem = functools.partial(pl.BlockSpec, memory_space=pltpu.MemorySpace.VMEM)
_smem = functools.partial(pl.BlockSpec, memory_space=pltpu.MemorySpace.SMEM)


def pallas_embed(input_ids, table, pos, gamma, beta):
    b, s = input_ids.shape
    _, d = table.shape
    ids = input_ids.reshape(b * s).astype(jnp.int32)
    pos_tiled = jnp.tile(pos, (b, 1))                  # (B*S, D)
    return pl.pallas_call(
        _embed_pos_ln_kernel,
        out_shape=jax.ShapeDtypeStruct((b * s, d), jnp.float32),
        in_specs=[_smem(), _vmem(), _vmem(), _vmem(), _vmem()],
        out_specs=_vmem(),
        scratch_shapes=[pltpu.VMEM((b * s, d), jnp.float32)],
        compiler_params=pltpu.CompilerParams(vmem_limit_bytes=_VMEM_LIMIT),
    )(ids, table, pos_tiled, gamma, beta)


def pallas_pos_ln(x2d, pos, gamma, beta, batch):
    pos_tiled = jnp.tile(pos, (batch, 1))
    return pl.pallas_call(
        _pos_ln_kernel,
        out_shape=jax.ShapeDtypeStruct(x2d.shape, jnp.float32),
        in_specs=[_vmem(), _vmem(), _vmem(), _vmem()],
        out_specs=_vmem(),
        compiler_params=pltpu.CompilerParams(vmem_limit_bytes=_VMEM_LIMIT),
    )(x2d, pos_tiled, gamma, beta)


def pallas_linear(x, w, b, activation=None, *, tn=128, tk=128):
    m, k_dim = x.shape
    _, n = w.shape
    assert m % 8 == 0 and k_dim % tk == 0 and n % tn == 0
    tm = m                                             # small row count: 1 M-tile
    grid = (m // tm, n // tn, k_dim // tk)
    kernel = functools.partial(_linear_kernel, activation=activation)
    return pl.pallas_call(
        kernel,
        out_shape=jax.ShapeDtypeStruct((m, n), jnp.float32),
        grid_spec=pltpu.PrefetchScalarGridSpec(
            num_scalar_prefetch=0,
            grid=grid,
            in_specs=[pl.BlockSpec((tm, tk), lambda i, j, kk: (i, kk)),
                      pl.BlockSpec((tk, tn), lambda i, j, kk: (kk, j)),
                      pl.BlockSpec((1, tn), lambda i, j, kk: (0, j))],
            out_specs=pl.BlockSpec((tm, tn), lambda i, j, kk: (i, j)),
            scratch_shapes=[pltpu.VMEM((tm, tn), jnp.float32)]),
        compiler_params=pltpu.CompilerParams(
            dimension_semantics=("parallel", "parallel", "arbitrary"),
            vmem_limit_bytes=_VMEM_LIMIT),
    )(x, w, b)


def pallas_linear_res_ln(x, w, b, res, gamma, beta, *, tk=128):
    m, k_dim = x.shape
    _, n = w.shape
    assert m % 8 == 0 and k_dim % tk == 0
    tm, tn = m, n                                      # full row for the LN epilogue
    grid = (1, 1, k_dim // tk)
    return pl.pallas_call(
        _linear_res_ln_kernel,
        out_shape=jax.ShapeDtypeStruct((m, n), jnp.float32),
        grid_spec=pltpu.PrefetchScalarGridSpec(
            num_scalar_prefetch=0,
            grid=grid,
            in_specs=[pl.BlockSpec((tm, tk), lambda i, j, kk: (i, kk)),
                      pl.BlockSpec((tk, tn), lambda i, j, kk: (kk, j)),
                      pl.BlockSpec((1, tn), lambda i, j, kk: (0, j)),
                      pl.BlockSpec((tm, tn), lambda i, j, kk: (i, j)),
                      pl.BlockSpec((1, tn), lambda i, j, kk: (0, j)),
                      pl.BlockSpec((1, tn), lambda i, j, kk: (0, j))],
            out_specs=pl.BlockSpec((tm, tn), lambda i, j, kk: (i, j)),
            scratch_shapes=[pltpu.VMEM((tm, tn), jnp.float32)]),
        compiler_params=pltpu.CompilerParams(
            dimension_semantics=("parallel", "parallel", "arbitrary"),
            vmem_limit_bytes=_VMEM_LIMIT),
    )(x, w, b, res, gamma, beta)


def pallas_attention(qkv, attention_mask, alpha, *, num_heads, head_dim):
    b, s, three_d = qkv.shape
    d = num_heads * head_dim
    assert three_d == 3 * d
    mask3 = attention_mask.reshape(b, 1, s).astype(jnp.float32)
    alpha3 = alpha.reshape(b, 1, s).astype(jnp.float32)
    kernel = functools.partial(_attention_kernel, num_heads=num_heads,
                               head_dim=head_dim, scale=1.0 / math.sqrt(head_dim))
    return pl.pallas_call(
        kernel,
        out_shape=jax.ShapeDtypeStruct((b, s, d), jnp.float32),
        grid_spec=pltpu.PrefetchScalarGridSpec(
            num_scalar_prefetch=0,
            grid=(b,),
            in_specs=[pl.BlockSpec((1, s, three_d), lambda bb: (bb, 0, 0)),
                      pl.BlockSpec((1, 1, s), lambda bb: (bb, 0, 0)),
                      pl.BlockSpec((1, 1, s), lambda bb: (bb, 0, 0))],
            out_specs=pl.BlockSpec((1, s, d), lambda bb: (bb, 0, 0))),
        compiler_params=pltpu.CompilerParams(
            dimension_semantics=("parallel",),
            vmem_limit_bytes=_VMEM_LIMIT),
    )(qkv, mask3, alpha3)


def pallas_pool_classify(cls_hidden, wp, bp, wc, bc):
    b, _ = cls_hidden.shape
    n = wc.shape[1]
    return pl.pallas_call(
        _pool_classify_kernel,
        out_shape=jax.ShapeDtypeStruct((b, n), jnp.float32),
        in_specs=[_vmem()] * 5,
        out_specs=_vmem(),
        compiler_params=pltpu.CompilerParams(vmem_limit_bytes=_VMEM_LIMIT),
    )(cls_hidden, wp, bp, wc, bc)


# ----------------------------- parameters (synthetic, deterministic) -----------------------------

class KeyGen:
    def __init__(self, seed=0):
        self._base = jax.random.PRNGKey(seed)
        self._i = 0

    def __call__(self):
        k = jax.random.fold_in(self._base, self._i)
        self._i += 1
        return k


def build_params(vocab, seq, d_model, num_heads, ffn, num_layers, num_labels, seed=0):
    # TODO(synk): the spec's base_classifier is abstract; a small BERT-style
    # encoder with synthetic weights stands in for it here.
    assert d_model % num_heads == 0 and d_model % 128 == 0 and ffn % 128 == 0
    kg = KeyGen(seed)

    def dense(cin, cout):
        return jax.random.normal(kg(), (cin, cout), jnp.float32) * (cin ** -0.5)

    def bias(c):
        return 0.02 * jax.random.normal(kg(), (1, c), jnp.float32)

    def ln(c):
        return (jnp.ones((1, c), jnp.float32), jnp.zeros((1, c), jnp.float32))

    params = {
        "word_emb": 0.02 * jax.random.normal(kg(), (vocab, d_model), jnp.float32),
        "pos_emb": 0.02 * jax.random.normal(kg(), (seq, d_model), jnp.float32),
        "emb_ln": ln(d_model),
        "layers": [],
        "pool_w": dense(d_model, d_model),
        "pool_b": bias(d_model),
        "num_heads": num_heads,
        "num_labels": num_labels,
    }
    for _ in range(num_layers):
        params["layers"].append({
            "qkv_w": dense(d_model, 3 * d_model), "qkv_b": bias(3 * d_model),
            "out_w": dense(d_model, d_model), "out_b": bias(d_model), "ln1": ln(d_model),
            "ff1_w": dense(d_model, ffn), "ff1_b": bias(ffn),
            "ff2_w": dense(ffn, d_model), "ff2_b": bias(d_model), "ln2": ln(d_model),
        })
    # lane-dense classifier head: zero-pad the label columns out to 128 and
    # slice the real labels once at the very end of the forward pass.
    wc = dense(d_model, num_labels)
    bc = bias(num_labels)
    pad = 128 - num_labels
    params["cls_w"] = jnp.pad(wc, ((0, 0), (0, pad)))
    params["cls_b"] = jnp.pad(bc, ((0, 0), (0, pad)))
    return params


# ----------------------------- forward pass -----------------------------

def masked_text_classifier_forward(params, inputs_embeds=None, input_ids=None,
                                   attention_mask=None, alpha=None):
    """Mirrors MaskedTextClassifier.forward: embed ids if needed, combine
    attention_mask * alpha, run the classifier, return logits (B, num_labels)."""
    assert (input_ids is None) ^ (inputs_embeds is None)
    d_model = params["word_emb"].shape[1]
    num_heads = params["num_heads"]
    head_dim = d_model // num_heads

    if input_ids is not None:
        b, s = input_ids.shape
        x2d = pallas_embed(input_ids, params["word_emb"], params["pos_emb"],
                           *params["emb_ln"])
    else:
        b, s, _ = inputs_embeds.shape
        x2d = pallas_pos_ln(inputs_embeds.reshape(b * s, d_model).astype(jnp.float32),
                            params["pos_emb"], *params["emb_ln"], batch=b)

    if attention_mask is None:
        attention_mask = jnp.ones((b, s), jnp.int32)
    if alpha is None:
        alpha = jnp.ones_like(attention_mask)
    # attention_mask * alpha is fused inside the attention kernel (nonzero => attend).

    for lyr in params["layers"]:
        qkv = pallas_linear(x2d, lyr["qkv_w"], lyr["qkv_b"])             # (BS, 3D)
        attn = pallas_attention(qkv.reshape(b, s, 3 * d_model),
                                attention_mask, alpha,
                                num_heads=num_heads, head_dim=head_dim)  # (B,S,D)
        x2d = pallas_linear_res_ln(attn.reshape(b * s, d_model),
                                   lyr["out_w"], lyr["out_b"],
                                   x2d, *lyr["ln1"])                     # (BS, D)
        h = pallas_linear(x2d, lyr["ff1_w"], lyr["ff1_b"], activation="gelu")
        x2d = pallas_linear_res_ln(h, lyr["ff2_w"], lyr["ff2_b"],
                                   x2d, *lyr["ln2"])

    cls = x2d.reshape(b, s, d_model)[:, 0, :]                            # CLS token
    out = pallas_pool_classify(cls, params["pool_w"], params["pool_b"],
                               params["cls_w"], params["cls_b"])         # (B, 128)
    return out[:, :params["num_labels"]]


if __name__ == "__main__":
    B, S, D = 2, 16, 128
    VOCAB, LAYERS, HEADS, FFN, LABELS = 512, 2, 4, 256, 4

    params = build_params(VOCAB, S, D, HEADS, FFN, LAYERS, LABELS, seed=0)

    key = jax.random.PRNGKey(0)
    k_ids, _ = jax.random.split(key)
    input_ids = jax.random.randint(k_ids, (B, S), 0, VOCAB, dtype=jnp.int32)
    attention_mask = jnp.ones((B, S), jnp.int32).at[:, 12:].set(0)   # pad last tokens
    alpha = jnp.ones((B, S), jnp.int32).at[1, 5].set(0)              # attribution mask

    logits = masked_text_classifier_forward(params, input_ids=input_ids,
                                            attention_mask=attention_mask,
                                            alpha=alpha)
    logits = jax.block_until_ready(logits)
    assert logits.shape == (B, LABELS), logits.shape
    assert bool(jnp.all(jnp.isfinite(logits)))
    print("KERNEL_OK")
</pallas_src>

<mosaic_0001>
module attributes {stable_mosaic.version = 11 : i64} {
  func.func @_embed_pos_ln_kernel(%arg0: memref<32xi32, #tpu.memory_space<smem>>, %arg1: memref<512x128xf32, #tpu.memory_space<vmem>>, %arg2: memref<32x128xf32, #tpu.memory_space<vmem>>, %arg3: memref<1x128xf32, #tpu.memory_space<vmem>>, %arg4: memref<1x128xf32, #tpu.memory_space<vmem>>, %arg5: memref<32x128xf32, #tpu.memory_space<vmem>>, %arg6: memref<32x128xf32, #tpu.memory_space<vmem>>) attributes {dimension_semantics = [], scalar_prefetch = 0 : i64, scratch_operands = 1 : i64, tpu.core_type = #tpu.core_type<tc>} {
    %c0 = arith.constant 0 : index
    %0 = memref.load %arg0[%c0] : memref<32xi32, #tpu.memory_space<smem>>
    %1 = arith.index_cast %0 : i32 to index
    %c0_0 = arith.constant 0 : index
    %2 = vector.load %arg1[%1, %c0_0] : memref<512x128xf32, #tpu.memory_space<vmem>>, vector<1x128xf32>
    %c0_1 = arith.constant 0 : index
    %c0_2 = arith.constant 0 : index
    %3 = vector.load %arg6[%c0_1, %c0_2] : memref<32x128xf32, #tpu.memory_space<vmem>>, vector<1x128xf32>
    tpu.vector_store %arg6[%c0_1, %c0_2], %2 {strides = array<i32>} : memref<32x128xf32, #tpu.memory_space<vmem>>, vector<1x128xf32>,
    %c1 = arith.constant 1 : index
    %4 = memref.load %arg0[%c1] : memref<32xi32, #tpu.memory_space<smem>>
    %5 = arith.index_cast %4 : i32 to index
    %c0_3 = arith.constant 0 : index
    %6 = vector.load %arg1[%5, %c0_3] : memref<512x128xf32, #tpu.memory_space<vmem>>, vector<1x128xf32>
    %c1_4 = arith.constant 1 : index
    %c0_5 = arith.constant 0 : index
    %7 = vector.load %arg6[%c1_4, %c0_5] : memref<32x128xf32, #tpu.memory_space<vmem>>, vector<1x128xf32>
    tpu.vector_store %arg6[%c1_4, %c0_5], %6 {strides = array<i32>} : memref<32x128xf32, #tpu.memory_space<vmem>>, vector<1x128xf32>,
    %c2 = arith.constant 2 : index
    %8 = memref.load %arg0[%c2] : memref<32xi32, #tpu.memory_space<smem>>
    %9 = arith.index_cast %8 : i32 to index
    %c0_6 = arith.constant 0 : index
    %10 = vector.load %arg1[%9, %c0_6] : memref<512x128xf32, #tpu.memory_space<vmem>>, vector<1x128xf32>
    %c2_7 = arith.constant 2 : index
    %c0_8 = arith.constant 0 : index
    %11 = vector.load %arg6[%c2_7, %c0_8] : memref<32x128xf32, #tpu.memory_space<vmem>>, vector<1x128xf32>
    tpu.vector_store %arg6[%c2_7, %c0_8], %10 {strides = array<i32>} : memref<32x128xf32, #tpu.memory_space<vmem>>, vector<1x128xf32>,
    %c3 = arith.constant 3 : index
    %12 = memref.load %arg0[%c3] : memref<32xi32, #tpu.memory_space<smem>>
    %13 = arith.index_cast %12 : i32 to index
    %c0_9 = arith.constant 0 : index
    %14 = vector.load %arg1[%13, %c0_9] : memref<512x128xf32, #tpu.memory_space<vmem>>, vector<1x128xf32>
    %c3_10 = arith.constant 3 : index
    %c0_11 = arith.constant 0 : index
    %15 = vector.load %arg6[%c3_10, %c0_11] : memref<32x128xf32, #tpu.memory_space<vmem>>, vector<1x128xf32>
    tpu.vector_store %arg6[%c3_10, %c0_11], %14 {strides = array<i32>} : memref<32x128xf32, #tpu.memory_space<vmem>>, vector<1x128xf32>,
    %c4 = arith.constant 4 : index
    %16 = memref.load %arg0[%c4] : memref<32xi32, #tpu.memory_space<smem>>
    %17 = arith.index_cast %16 : i32 to index
    %c0_12 = arith.constant 0 : index
    %18 = vector.load %arg1[%17, %c0_12] : memref<512x128xf32, #tpu.memory_space<vmem>>, vector<1x128xf32>
    %c4_13 = arith.constant 4 : index
    %c0_14 = arith.constant 0 : index
    %19 = vector.load %arg6[%c4_13, %c0_14] : memref<32x128xf32, #tpu.memory_space<vmem>>, vector<1x128xf32>
    tpu.vector_store %arg6[%c4_13, %c0_14], %18 {strides = array<i32>} : memref<32x128xf32, #tpu.memory_space<vmem>>, vector<1x128xf32>,
    %c5 = arith.constant 5 : index
    %20 = memref.load %arg0[%c5] : memref<32xi32, #tpu.memory_space<smem>>
    %21 = arith.index_cast %20 : i32 to index
    %c0_15 = arith.constant 0 : index
    %22 = vector.load %arg1[%21, %c0_15] : memref<512x128xf32, #tpu.memory_space<vmem>>, vector<1x128xf32>
    %c5_16 = arith.constant 5 : index
    %c0_17 = arith.constant 0 : index
    %23 = vector.load %arg6[%c5_16, %c0_17] : memref<32x128xf32, #tpu.memory_space<vmem>>, vector<1x128xf32>
    tpu.vector_store %arg6[%c5_16, %c0_17], %22 {strides = array<i32>} : memref<32x128xf32, #tpu.memory_space<vmem>>, vector<1x128xf32>,
    %c6 = arith.constant 6 : index
    %24 = memref.load %arg0[%c6] : memref<32xi32, #tpu.memory_space<smem>>
    %25 = arith.index_cast %24 : i32 to index
    %c0_18 = arith.constant 0 : index
    %26 = vector.load %arg1[%25, %c0_18] : memref<512x128xf32, #tpu.memory_space<vmem>>, vector<1x128xf32>
    %c6_19 = arith.constant 6 : index
    %c0_20 = arith.constant 0 : index
    %27 = vector.load %arg6[%c6_19, %c0_20] : memref<32x128xf32, #tpu.memory_space<vmem>>, vector<1x128xf32>
    tpu.vector_store %arg6[%c6_19, %c0_20], %26 {strides = array<i32>} : memref<32x128xf32, #tpu.memory_space<vmem>>, vector<1x128xf32>,
    %c7 = arith.constant 7 : index
    %28 = memref.load %arg0[%c7] : memref<32xi32, #tpu.memory_space<smem>>
    %29 = arith.index_cast %28 : i32 to index
    %c0_21 = arith.constant 0 : index
    %30 = vector.load %arg1[%29, %c0_21] : memref<512x128xf32, #tpu.memory_space<vmem>>, vector<1x128xf32>
    %c7_22 = arith.constant 7 : index
    %c0_23 = arith.constant 0 : index
    %31 = vector.load %arg6[%c7_22, %c0_23] : memref<32x128xf32, #tpu.memory_space<vmem>>, vector<1x128xf32>
    tpu.vector_store %arg6[%c7_22, %c0_23], %30 {strides = array<i32>} : memref<32x128xf32, #tpu.memory_space<vmem>>, vector<1x128xf32>,
    %c8 = arith.constant 8 : index
    %32 = memref.load %arg0[%c8] : memref<32xi32, #tpu.memory_space<smem>>
    %33 = arith.index_cast %32 : i32 to index
    %c0_24 = arith.constant 0 : index
    %34 = vector.load %arg1[%33, %c0_24] : memref<512x128xf32, #tpu.memory_space<vmem>>, vector<1x128xf32>
    %c8_25 = arith.constant 8 : index
    %c0_26 = arith.constant 0 : index
    %35 = vector.load %arg6[%c8_25, %c0_26] : memref<32x128xf32, #tpu.memory_space<vmem>>, vector<1x128xf32>
    tpu.vector_store %arg6[%c8_25, %c0_26], %34 {strides = array<i32>} : memref<32x128xf32, #tpu.memory_space<vmem>>, vector<1x128xf32>,
    %c9 = arith.constant 9 : index
    %36 = memref.load %arg0[%c9] : memref<32xi32, #tpu.memory_space<smem>>
    %37 = arith.index_cast %36 : i32 to index
    %c0_27 = arith.constant 0 : index
    %38 = vector.load %arg1[%37, %c0_27] : memref<512x128xf32, #tpu.memory_space<vmem>>, vector<1x128xf32>
    %c9_28 = arith.constant 9 : index
    %c0_29 = arith.constant 0 : index
    %39 = vector.load %arg6[%c9_28, %c0_29] : memref<32x128xf32, #tpu.memory_space<vmem>>, vector<1x128xf32>
    tpu.vector_store %arg6[%c9_28, %c0_29], %38 {strides = array<i32>} : memref<32x128xf32, #tpu.memory_space<vmem>>, vector<1x128xf32>,
    %c10 = arith.constant 10 : index
    %40 = memref.load %arg0[%c10] : memref<32xi32, #tpu.memory_space<smem>>
    %41 = arith.index_cast %40 : i32 to index
    %c0_30 = arith.constant 0 : index
    %42 = vector.load %arg1[%41, %c0_30] : memref<512x128xf32, #tpu.memory_space<vmem>>, vector<1x128xf32>
    %c10_31 = arith.constant 10 : index
    %c0_32 = arith.constant 0 : index
    %43 = vector.load %arg6[%c10_31, %c0_32] : memref<32x128xf32, #tpu.memory_space<vmem>>, vector<1x128xf32>
    tpu.vector_store %arg6[%c10_31, %c0_32], %42 {strides = array<i32>} : memref<32x128xf32, #tpu.memory_space<vmem>>, vector<1x128xf32>,
    %c11 = arith.constant 11 : index
    %44 = memref.load %arg0[%c11] : memref<32xi32, #tpu.memory_space<smem>>
    %45 = arith.index_cast %44 : i32 to index
    %c0_33 = arith.constant 0 : index
    %46 = vector.load %arg1[%45, %c0_33] : memref<512x128xf32, #tpu.memory_space<vmem>>, vector<1x128xf32>
    %c11_34 = arith.constant 11 : index
    %c0_35 = arith.constant 0 : index
    %47 = vector.load %arg6[%c11_34, %c0_35] : memref<32x128xf32, #tpu.memory_space<vmem>>, vector<1x128xf32>
    tpu.vector_store %arg6[%c11_34, %c0_35], %46 {strides = array<i32>} : memref<32x128xf32, #tpu.memory_space<vmem>>, vector<1x128xf32>,
    %c12 = arith.constant 12 : index
    %48 = memref.load %arg0[%c12] : memref<32xi32, #tpu.memory_space<smem>>
    %49 = arith.index_cast %48 : i32 to index
    %c0_36 = arith.constant 0 : index
    %50 = vector.load %arg1[%49, %c0_36] : memref<512x128xf32, #tpu.memory_space<vmem>>, vector<1x128xf32>
    %c12_37 = arith.constant 12 : index
    %c0_38 = arith.constant 0 : index
    %51 = vector.load %arg6[%c12_37, %c0_38] : memref<32x128xf32, #tpu.memory_space<vmem>>, vector<1x128xf32>
    tpu.vector_store %arg6[%c12_37, %c0_38], %50 {strides = array<i32>} : memref<32x128xf32, #tpu.memory_space<vmem>>, vector<1x128xf32>,
    %c13 = arith.constant 13 : index
    %52 = memref.load %arg0[%c13] : memref<32xi32, #tpu.memory_space<smem>>
    %53 = arith.index_cast %52 : i32 to index
    %c0_39 = arith.constant 0 : index
    %54 = vector.load %arg1[%53, %c0_39] : memref<512x128xf32, #tpu.memory_space<vmem>>, vector<1x128xf32>
    %c13_40 = arith.constant 13 : index
    %c0_41 = arith.constant 0 : index
    %55 = vector.load %arg6[%c13_40, %c0_41] : memref<32x128xf32, #tpu.memory_space<vmem>>, vector<1x128xf32>
    tpu.vector_store %arg6[%c13_40, %c0_41], %54 {strides = array<i32>} : memref<32x128xf32, #tpu.memory_space<vmem>>, vector<1x128xf32>,
    %c14 = arith.constant 14 : index
    %56 = memref.load %arg0[%c14] : memref<32xi32, #tpu.memory_space<smem>>
    %57 = arith.index_cast %56 : i32 to index
    %c0_42 = arith.constant 0 : index
    %58 = vector.load %arg1[%57, %c0_42] : memref<512x128xf32, #tpu.memory_space<vmem>>, vector<1x128xf32>
    %c14_43 = arith.constant 14 : index
    %c0_44 = arith.constant 0 : index
    %59 = vector.load %arg6[%c14_43, %c0_44] : memref<32x128xf32, #tpu.memory_space<vmem>>, vector<1x128xf32>
    tpu.vector_store %arg6[%c14_43, %c0_44], %58 {strides = array<i32>} : memref<32x128xf32, #tpu.memory_space<vmem>>, vector<1x128xf32>,
    %c15 = arith.constant 15 : index
    %60 = memref.load %arg0[%c15] : memref<32xi32, #tpu.memory_space<smem>>
    %61 = arith.index_cast %60 : i32 to index
    %c0_45 = arith.constant 0 : index
    %62 = vector.load %arg1[%61, %c0_45] : memref<512x128xf32, #tpu.memory_space<vmem>>, vector<1x128xf32>
    %c15_46 = arith.constant 15 : index
    %c0_47 = arith.constant 0 : index
    %63 = vector.load %arg6[%c15_46, %c0_47] : memref<32x128xf32, #tpu.memory_space<vmem>>, vector<1x128xf32>
    tpu.vector_store %arg6[%c15_46, %c0_47], %62 {strides = array<i32>} : memref<32x128xf32, #tpu.memory_space<vmem>>, vector<1x128xf32>,
    %c16 = arith.constant 16 : index
    %64 = memref.load %arg0[%c16] : memref<32xi32, #tpu.memory_space<smem>>
    %65 = arith.index_cast %64 : i32 to index
    %c0_48 = arith.constant 0 : index
    %66 = vector.load %arg1[%65, %c0_48] : memref<512x128xf32, #tpu.memory_space<vmem>>, vector<1x128xf32>
    %c16_49 = arith.constant 16 : index
    %c0_50 = arith.constant 0 : index
    %67 = vector.load %arg6[%c16_49, %c0_50] : memref<32x128xf32, #tpu.memory_space<vmem>>, vector<1x128xf32>
    tpu.vector_store %arg6[%c16_49, %c0_50], %66 {strides = array<i32>} : memref<32x128xf32, #tpu.memory_space<vmem>>, vector<1x128xf32>,
    %c17 = arith.constant 17 : index
    %68 = memref.load %arg0[%c17] : memref<32xi32, #tpu.memory_space<smem>>
    %69 = arith.index_cast %68 : i32 to index
    %c0_51 = arith.constant 0 : index
    %70 = vector.load %arg1[%69, %c0_51] : memref<512x128xf32, #tpu.memory_space<vmem>>, vector<1x128xf32>
    %c17_52 = arith.constant 17 : index
    %c0_53 = arith.constant 0 : index
    %71 = vector.load %arg6[%c17_52, %c0_53] : memref<32x128xf32, #tpu.memory_space<vmem>>, vector<1x128xf32>
    tpu.vector_store %arg6[%c17_52, %c0_53], %70 {strides = array<i32>} : memref<32x128xf32, #tpu.memory_space<vmem>>, vector<1x128xf32>,
    %c18 = arith.constant 18 : index
    %72 = memref.load %arg0[%c18] : memref<32xi32, #tpu.memory_space<smem>>
    %73 = arith.index_cast %72 : i32 to index
    %c0_54 = arith.constant 0 : index
    %74 = vector.load %arg1[%73, %c0_54] : memref<512x128xf32, #tpu.memory_space<vmem>>, vector<1x128xf32>
    %c18_55 = arith.constant 18 : index
    %c0_56 = arith.constant 0 : index
    %75 = vector.load %arg6[%c18_55, %c0_56] : memref<32x128xf32, #tpu.memory_space<vmem>>, vector<1x128xf32>
    tpu.vector_store %arg6[%c18_55, %c0_56], %74 {strides = array<i32>} : memref<32x128xf32, #tpu.memory_space<vmem>>, vector<1x128xf32>,
    %c19 = arith.constant 19 : index
    %76 = memref.load %arg0[%c19] : memref<32xi32, #tpu.memory_space<smem>>
    %77 = arith.index_cast %76 : i32 to index
    %c0_57 = arith.constant 0 : index
    %78 = vector.load %arg1[%77, %c0_57] : memref<512x128xf32, #tpu.memory_space<vmem>>, vector<1x128xf32>
    %c19_58 = arith.constant 19 : index
    %c0_59 = arith.constant 0 : index
    %79 = vector.load %arg6[%c19_58, %c0_59] : memref<32x128xf32, #tpu.memory_space<vmem>>, vector<1x128xf32>
    tpu.vector_store %arg6[%c19_58, %c0_59], %78 {strides = array<i32>} : memref<32x128xf32, #tpu.memory_space<vmem>>, vector<1x128xf32>,
    %c20 = arith.constant 20 : index
    %80 = memref.load %arg0[%c20] : memref<32xi32, #tpu.memory_space<smem>>
    %81 = arith.index_cast %80 : i32 to index
    %c0_60 = arith.constant 0 : index
    %82 = vector.load %arg1[%81, %c0_60] : memref<512x128xf32, #tpu.memory_space<vmem>>, vector<1x128xf32>
    %c20_61 = arith.constant 20 : index
    %c0_62 = arith.constant 0 : index
    %83 = vector.load %arg6[%c20_61, %c0_62] : memref<32x128xf32, #tpu.memory_space<vmem>>, vector<1x128xf32>
    tpu.vector_store %arg6[%c20_61, %c0_62], %82 {strides = array<i32>} : memref<32x128xf32, #tpu.memory_space<vmem>>, vector<1x128xf32>,
    %c21 = arith.constant 21 : index
    %84 = memref.load %arg0[%c21] : memref<32xi32, #tpu.memory_space<smem>>
    %85 = arith.index_cast %84 : i32 to index
    %c0_63 = arith.constant 0 : index
    %86 = vector.load %arg1[%85, %c0_63] : memref<512x128xf32, #tpu.memory_space<vmem>>, vector<1x128xf32>
    %c21_64 = arith.constant 21 : index
    %c0_65 = arith.constant 0 : index
    %87 = vector.load %arg6[%c21_64, %c0_65] : memref<32x128xf32, #tpu.memory_space<vmem>>, vector<1x128xf32>
    tpu.vector_store %arg6[%c21_64, %c0_65], %86 {strides = array<i32>} : memref<32x128xf32, #tpu.memory_space<vmem>>, vector<1x128xf32>,
    %c22 = arith.constant 22 : index
    %88 = memref.load %arg0[%c22] : memref<32xi32, #tpu.memory_space<smem>>
    %89 = arith.index_cast %88 : i32 to index
    %c0_66 = arith.constant 0 : index
    %90 = vector.load %arg1[%89, %c0_66] : memref<512x128xf32, #tpu.memory_space<vmem>>, vector<1x128xf32>
    %c22_67 = arith.constant 22 : index
    %c0_68 = arith.constant 0 : index
    %91 = vector.load %arg6[%c22_67, %c0_68] : memref<32x128xf32, #tpu.memory_space<vmem>>, vector<1x128xf32>
    tpu.vector_store %arg6[%c22_67, %c0_68], %90 {strides = array<i32>} : memref<32x128xf32, #tpu.memory_space<vmem>>, vector<1x128xf32>,
    %c23 = arith.constant 23 : index
    %92 = memref.load %arg0[%c23] : memref<32xi32, #tpu.memory_space<smem>>
    %93 = arith.index_cast %92 : i32 to index
    %c0_69 = arith.constant 0 : index
    %94 = vector.load %arg1[%93, %c0_69] : memref<512x128xf32, #tpu.memory_space<vmem>>, vector<1x128xf32>
    %c23_70 = arith.constant 23 : index
    %c0_71 = arith.constant 0 : index
    %95 = vector.load %arg6[%c23_70, %c0_71] : memref<32x128xf32, #tpu.memory_space<vmem>>, vector<1x128xf32>
    tpu.vector_store %arg6[%c23_70, %c0_71], %94 {strides = array<i32>} : memref<32x128xf32, #tpu.memory_space<vmem>>, vector<1x128xf32>,
    %c24 = arith.constant 24 : index
    %96 = memref.load %arg0[%c24] : memref<32xi32, #tpu.memory_space<smem>>
    %97 = arith.index_cast %96 : i32 to index
    %c0_72 = arith.constant 0 : index
    %98 = vector.load %arg1[%97, %c0_72] : memref<512x128xf32, #tpu.memory_space<vmem>>, vector<1x128xf32>
    %c24_73 = arith.constant 24 : index
    %c0_74 = arith.constant 0 : index
    %99 = vector.load %arg6[%c24_73, %c0_74] : memref<32x128xf32, #tpu.memory_space<vmem>>, vector<1x128xf32>
    tpu.vector_store %arg6[%c24_73, %c0_74], %98 {strides = array<i32>} : memref<32x128xf32, #tpu.memory_space<vmem>>, vector<1x128xf32>,
    %c25 = arith.constant 25 : index
    %100 = memref.load %arg0[%c25] : memref<32xi32, #tpu.memory_space<smem>>
    %101 = arith.index_cast %100 : i32 to index
    %c0_75 = arith.constant 0 : index
    %102 = vector.load %arg1[%101, %c0_75] : memref<512x128xf32, #tpu.memory_space<vmem>>, vector<1x128xf32>
    %c25_76 = arith.constant 25 : index
    %c0_77 = arith.constant 0 : index
    %103 = vector.load %arg6[%c25_76, %c0_77] : memref<32x128xf32, #tpu.memory_space<vmem>>, vector<1x128xf32>
    tpu.vector_store %arg6[%c25_76, %c0_77], %102 {strides = array<i32>} : memref<32x128xf32, #tpu.memory_space<vmem>>, vector<1x128xf32>,
    %c26 = arith.constant 26 : index
    %104 = memref.load %arg0[%c26] : memref<32xi32, #tpu.memory_space<smem>>
    %105 = arith.index_cast %104 : i32 to index
    %c0_78 = arith.constant 0 : index
    %106 = vector.load %arg1[%105, %c0_78] : memref<512x128xf32, #tpu.memory_space<vmem>>, vector<1x128xf32>
    %c26_79 = arith.constant 26 : index
    %c0_80 = arith.constant 0 : index
    %107 = vector.load %arg6[%c26_79, %c0_80] : memref<32x128xf32, #tpu.memory_space<vmem>>, vector<1x128xf32>
    tpu.vector_store %arg6[%c26_79, %c0_80], %106 {strides = array<i32>} : memref<32x128xf32, #tpu.memory_space<vmem>>, vector<1x128xf32>,
    %c27 = arith.constant 27 : index
    %108 = memref.load %arg0[%c27] : memref<32xi32, #tpu.memory_space<smem>>
    %109 = arith.index_cast %108 : i32 to index
    %c0_81 = arith.constant 0 : index
    %110 = vector.load %arg1[%109, %c0_81] : memref<512x128xf32, #tpu.memory_space<vmem>>, vector<1x128xf32>
    %c27_82 = arith.constant 27 : index
    %c0_83 = arith.constant 0 : index
    %111 = vector.load %arg6[%c27_82, %c0_83] : memref<32x128xf32, #tpu.memory_space<vmem>>, vector<1x128xf32>
    tpu.vector_store %arg6[%c27_82, %c0_83], %110 {strides = array<i32>} : memref<32x128xf32, #tpu.memory_space<vmem>>, vector<1x128xf32>,
    %c28 = arith.constant 28 : index
    %112 = memref.load %arg0[%c28] : memref<32xi32, #tpu.memory_space<smem>>
    %113 = arith.index_cast %112 : i32 to index
    %c0_84 = arith.constant 0 : index
    %114 = vector.load %arg1[%113, %c0_84] : memref<512x128xf32, #tpu.memory_space<vmem>>, vector<1x128xf32>
    %c28_85 = arith.constant 28 : index
    %c0_86 = arith.constant 0 : index
    %115 = vector.load %arg6[%c28_85, %c0_86] : memref<32x128xf32, #tpu.memory_space<vmem>>, vector<1x128xf32>
    tpu.vector_store %arg6[%c28_85, %c0_86], %114 {strides = array<i32>} : memref<32x128xf32, #tpu.memory_space<vmem>>, vector<1x128xf32>,
    %c29 = arith.constant 29 : index
    %116 = memref.load %arg0[%c29] : memref<32xi32, #tpu.memory_space<smem>>
    %117 = arith.index_cast %116 : i32 to index
    %c0_87 = arith.constant 0 : index
    %118 = vector.load %arg1[%117, %c0_87] : memref<512x128xf32, #tpu.memory_space<vmem>>, vector<1x128xf32>
    %c29_88 = arith.constant 29 : index
    %c0_89 = arith.constant 0 : index
    %119 = vector.load %arg6[%c29_88, %c0_89] : memref<32x128xf32, #tpu.memory_space<vmem>>, vector<1x128xf32>
    tpu.vector_store %arg6[%c29_88, %c0_89], %118 {strides = array<i32>} : memref<32x128xf32, #tpu.memory_space<vmem>>, vector<1x128xf32>,
    %c30 = arith.constant 30 : index
    %120 = memref.load %arg0[%c30] : memref<32xi32, #tpu.memory_space<smem>>
    %121 = arith.index_cast %120 : i32 to index
    %c0_90 = arith.constant 0 : index
    %122 = vector.load %arg1[%121, %c0_90] : memref<512x128xf32, #tpu.memory_space<vmem>>, vector<1x128xf32>
    %c30_91 = arith.constant 30 : index
    %c0_92 = arith.constant 0 : index
    %123 = vector.load %arg6[%c30_91, %c0_92] : memref<32x128xf32, #tpu.memory_space<vmem>>, vector<1x128xf32>
    tpu.vector_store %arg6[%c30_91, %c0_92], %122 {strides = array<i32>} : memref<32x128xf32, #tpu.memory_space<vmem>>, vector<1x128xf32>,
    %c31 = arith.constant 31 : index
    %124 = memref.load %arg0[%c31] : memref<32xi32, #tpu.memory_space<smem>>
    %125 = arith.index_cast %124 : i32 to index
    %c0_93 = arith.constant 0 : index
    %126 = vector.load %arg1[%125, %c0_93] : memref<512x128xf32, #tpu.memory_space<vmem>>, vector<1x128xf32>
    %c31_94 = arith.constant 31 : index
    %c0_95 = arith.constant 0 : index
    %127 = vector.load %arg6[%c31_94, %c0_95] : memref<32x128xf32, #tpu.memory_space<vmem>>, vector<1x128xf32>
    tpu.vector_store %arg6[%c31_94, %c0_95], %126 {strides = array<i32>} : memref<32x128xf32, #tpu.memory_space<vmem>>, vector<1x128xf32>,
    %c0_96 = arith.constant 0 : index
    %c0_97 = arith.constant 0 : index
    %128 = vector.load %arg6[%c0_96, %c0_97] : memref<32x128xf32, #tpu.memory_space<vmem>>, vector<32x128xf32>
    %c0_98 = arith.constant 0 : index
    %c0_99 = arith.constant 0 : index
    %129 = vector.load %arg2[%c0_98, %c0_99] : memref<32x128xf32, #tpu.memory_space<vmem>>, vector<32x128xf32>
    %130 = arith.addf %128, %129 : vector<32x128xf32>
    %c0_100 = arith.constant 0 : index
    %c0_101 = arith.constant 0 : index
    %131 = vector.load %arg3[%c0_100, %c0_101] : memref<1x128xf32, #tpu.memory_space<vmem>>, vector<1x128xf32>
    %c0_102 = arith.constant 0 : index
    %c0_103 = arith.constant 0 : index
    %132 = vector.load %arg4[%c0_102, %c0_103] : memref<1x128xf32, #tpu.memory_space<vmem>>, vector<1x128xf32>
    %cst = arith.constant dense<0.000000e+00> : vector<32xf32>
    %133 = vector.multi_reduction <add>, %130, %cst [1] : vector<32x128xf32> to vector<32xf32>
    %134 = vector.shape_cast %133 : vector<32xf32> to vector<32x1xf32>
    %cst_104 = arith.constant 1.280000e+02 : f32
    %135 = vector.broadcast %cst_104 : f32 to vector<32x1xf32>
    %136 = arith.divf %134, %135 : vector<32x1xf32>
    %137 = vector.broadcast %136 : vector<32x1xf32> to vector<32x128xf32>
    %138 = arith.subf %130, %137 : vector<32x128xf32>
    %139 = arith.mulf %138, %138 : vector<32x128xf32>
    %cst_105 = arith.constant dense<0.000000e+00> : vector<32xf32>
    %140 = vector.multi_reduction <add>, %139, %cst_105 [1] : vector<32x128xf32> to vector<32xf32>
    %141 = vector.shape_cast %140 : vector<32xf32> to vector<32x1xf32>
    %cst_106 = arith.constant 1.280000e+02 : f32
    %142 = vector.broadcast %cst_106 : f32 to vector<32x1xf32>
    %143 = arith.divf %141, %142 : vector<32x1xf32>
    %144 = vector.broadcast %136 : vector<32x1xf32> to vector<32x128xf32>
    %145 = arith.subf %130, %144 : vector<32x128xf32>
    %cst_107 = arith.constant 9.99999996E-13 : f32
    %146 = vector.broadcast %cst_107 : f32 to vector<32x1xf32>
    %147 = arith.addf %143, %146 : vector<32x1xf32>
    %148 = math.rsqrt %147 : vector<32x1xf32>
    %149 = vector.broadcast %148 : vector<32x1xf32> to vector<32x128xf32>
    %150 = arith.mulf %145, %149 : vector<32x128xf32>
    %151 = vector.broadcast %131 : vector<1x128xf32> to vector<32x128xf32>
    %152 = arith.mulf %150, %151 : vector<32x128xf32>
    %153 = vector.broadcast %132 : vector<1x128xf32> to vector<32x128xf32>
    %154 = arith.addf %152, %153 : vector<32x128xf32>
    %c0_108 = arith.constant 0 : index
    %c0_109 = arith.constant 0 : index
    %155 = vector.load %arg5[%c0_108, %c0_109] : memref<32x128xf32, #tpu.memory_space<vmem>>, vector<32x128xf32>
    tpu.vector_store %arg5[%c0_108, %c0_109], %154 {strides = array<i32>} : memref<32x128xf32, #tpu.memory_space<vmem>>, vector<32x128xf32>,
    return
  }
}

</mosaic_0001>

<bundles_post_ra>
// kernel: tpu_custom_call.1
= control target key start
LH: loop header
LB: loop body
LE: loop exit
PB: predicated region body
PF: predicated region fallthrough
CT: control target
= control target key end

     0   :  { %10 = vsyncpa [#allocation6], 0  ;;  %s586_s0 = inlined_call_operand.hbm [shape: s32[32], index: 0, kind: input, shape index: {}]   ;;  %s587_s1 = inlined_call_operand.hbm [shape: f32[512,128], index: 1, kind: input, shape index: {}]   ;;  %s588_s2 = inlined_call_operand.hbm [shape: f32[32,128], index: 2, kind: input, shape index: {}]   ;;  %s589_s3 = inlined_call_operand.vmem [shape: f32[1,128], index: 3, kind: input, shape index: {}]   ;;  %s590_s4 = inlined_call_operand.vmem [shape: f32[1,128], index: 4, kind: input, shape index: {}]   ;;  %s591_s5 = inlined_call_operand.hbm [shape: f32[32,128], index: 5, kind: output, shape index: {}]  }
   0x1   :  { %11 = vsyncpa [#allocation4], 0 }
   0x2   :  { %12 = vsyncpa [#allocation9], 0 }
   0x3   :  { %13 = vsyncpa [#allocation5], 0  ;;  %s369_s20 = scalar_lea.hbm %s586_s0, 16 }
   0x4   :  { %p370_p0 = scmp.ne.s32.totalorder %s586_s0, %s369_s20  ;;  %p373_p1 = scmp.lt.u32.totalorder %s369_s20, %s586_s0 }
   0x6   :  { %p375_p2 = pnand %p373_p1, %p370_p0 }
   0x8   :  { %378 = shalt.err (!%p375_p2)
}
   0x9   :  { %s453_s25 = smov [#allocation3]   ;;  %s454_s28 = smov [#allocation7]  }
   0xa   :  { %21 = dma.hbm_to_smem %s586_s0, 16, %s453_s25, [#allocation6]  }
   0xb   :  { %s27_s29 = sshll.u32 %s454_s28, 4  ;;  %s379_s7 = scalar_lea.hbm %s587_s1, 8192  ;;  %s28_s29 = int_to_ptr.vmem [resolvable:$true] %s27_s29 }
   0xc   :  { %p380_p3 = scmp.ne.s32.totalorder %s587_s1, %s379_s7  ;;  %p383_p4 = scmp.lt.u32.totalorder %s379_s7, %s587_s1 }
   0xe   :  { %p385_p5 = pnand %p383_p4, %p380_p3 }
  0x10   :  { %388 = shalt.err (!%p385_p5)
}
  0x11   :  { %s389_s12 = scalar_lea.vmem %s28_s29, 8192  ;;  %p394_p7 = scmp.lt.s32.totalorder %s28_s29, %s28_s29 }
  0x12   :  { %p390_p6 = scmp.ne.s32.totalorder %s28_s29, %s389_s12  ;;  %p395_p8 = scmp.lt.s32.totalorder %s389_s12, %s389_s12 }
  0x14   :  { %p396_p9 = por %p395_p8, %p394_p7 }
  0x16   :  { %p397_p10 = pnand %p396_p9, %p390_p6 }
  0x18   :  { %400 = shalt.err (!%p397_p10)
}
  0x19   :  { %s455_s0 = smov 128   ;;  %s456_s13 = smov 8  }
  0x1a   :  { %33 = dma.hbm_to_vmem [thread:$0]  %s587_s1, 8192, %s28_s29, [#allocation4], %s455_s0, %s455_s0, %s456_s13  }
  0x1b   :  { %s457_s16 = smov [#allocation8]   ;;  %s401_s20 = scalar_lea.hbm %s588_s2, 512 }
  0x1c   :  { %s39_s17 = sshll.u32 %s457_s16, 4  ;;  %p402_p11 = scmp.ne.s32.totalorder %s588_s2, %s401_s20  ;;  %s40_s17 = int_to_ptr.vmem [resolvable:$true] %s39_s17 }
  0x1d   :  { %p405_p12 = scmp.lt.u32.totalorder %s401_s20, %s588_s2 }
  0x1f   :  { %p407_p13 = pnand %p405_p12, %p402_p11 }
  0x21   :  { %410 = shalt.err (!%p407_p13)
}
  0x22   :  { %s411_s25 = scalar_lea.vmem %s40_s17, 512  ;;  %p416_p1 = scmp.lt.s32.totalorder %s40_s17, %s40_s17 }
  0x23   :  { %p412_p0 = scmp.ne.s32.totalorder %s40_s17, %s411_s25  ;;  %p417_p2 = scmp.lt.s32.totalorder %s411_s25, %s411_s25 }
  0x25   :  { %p418_p3 = por %p417_p2, %p416_p1 }
  0x27   :  { %p419_p4 = pnand %p418_p3, %p412_p0 }
  0x29   :  { %422 = shalt.err (!%p419_p4)
}
  0x2a   :  { %45 = dma.hbm_to_vmem [thread:$0]  %s588_s2, 512, %s40_s17, [#allocation9], %s455_s0, %s455_s0, %s456_s13  }
  0x2b   :  { %445 = dma.done.wait [#allocation6], 16  }
  0x2c   :  { %446 = vsyncadd [#allocation6], 4294967280 }
  0x2d   :  { %447 = dma.done.wait [#allocation4], 8192  }
  0x2e   :  { %448 = vsyncadd [#allocation4], 4294959104 }
  0x2f   :  { %449 = dma.done.wait [#allocation9], 512  }
  0x30   :  { %450 = vsyncadd [#allocation9], 4294966784 }
  0x31   :  { %59 = sfence }
  0x32   :  { %s60_s27 = sld [smem:[#allocation3]]  ;;  %s322_s28 = sld [smem:[#allocation3 + $0x1]]  ;;  %v192_v12 = vld [vmem:[#allocation8] sm:$0xff]  ;;  %v194_v27 = vld [vmem:[#allocation8 + $0x10] sm:$0xff]  ;;  %v193_v30 = vld [vmem:[#allocation8 + $0x8] sm:$0xff] }
  0x33   :  { %s323_s29 = sld [smem:[#allocation3 + $0x2]]  ;;  %s324_s30 = sld [smem:[#allocation3 + $0x3]]  ;;  %v195_v41 = vld [vmem:[#allocation8 + $0x18] sm:$0xff] }
  0x34   :  { %s325_s6 = sld [smem:[#allocation3 + $0x4]]  ;;  %s326_s7 = sld [smem:[#allocation3 + $0x5]] }
  0x35   :  { %s327_s8 = sld [smem:[#allocation3 + $0x6]]  ;;  %s328_s9 = sld [smem:[#allocation3 + $0x7]] }
  0x36   :  { %s531_s10 = sld [smem:[#allocation3 + $0x10]]  ;;  %s533_s11 = sld [smem:[#allocation3 + $0x11]] }
  0x37   :  { %s535_s2 = sld [smem:[#allocation3 + $0x12]]  ;;  %s537_s12 = sld [smem:[#allocation3 + $0x13]] }
  0x38   :  { %s61_s14 = scalar_lea.vmem [#allocation7], %s60_s27  ;;  %s65_s15 = scalar_lea.vmem [#allocation7], %s322_s28 }
  0x39   :  { %v62_v0 = vld [vmem:[%s61_s14] sm:$0x1]  ;;  %s69_s16 = scalar_lea.vmem [#allocation7], %s323_s29  ;;  %s73_s17 = scalar_lea.vmem [#allocation7], %s324_s30 }
  0x3a   :  { %v66_v1 = vld [vmem:[%s65_s15] sm:$0x1]  ;;  %63 = vst [vmem:[#allocation2] sm:$0x1] %v62_v0  ;;  %s77_s18 = scalar_lea.vmem [#allocation7], %s325_s6  ;;  %s81_s19 = scalar_lea.vmem [#allocation7], %s326_s7 }
  0x3b   :  { %67 = vst [vmem:[#allocation2 + $0x1] sm:$0x1] %v66_v1  ;;  %v70_v2 = vld [vmem:[%s69_s16] sm:$0x1]  ;;  %s85_s20 = scalar_lea.vmem [#allocation7], %s327_s8  ;;  %s89_s21 = scalar_lea.vmem [#allocation7], %s328_s9 }
  0x3c   :  { %v74_v3 = vld [vmem:[%s73_s17] sm:$0x1]  ;;  %71 = vst [vmem:[#allocation2 + $0x2] sm:$0x1] %v70_v2  ;;  %s125_s22 = scalar_lea.vmem [#allocation7], %s531_s10  ;;  %s129_s23 = scalar_lea.vmem [#allocation7], %s533_s11 }
  0x3d   :  { %75 = vst [vmem:[#allocation2 + $0x3] sm:$0x1] %v74_v3  ;;  %v78_v4 = vld [vmem:[%s77_s18] sm:$0x1]  ;;  %s133_s24 = scalar_lea.vmem [#allocation7], %s535_s2  ;;  %s137_s25 = scalar_lea.vmem [#allocation7], %s537_s12 }
  0x3e   :  { %v82_v5 = vld [vmem:[%s81_s19] sm:$0x1]  ;;  %79 = vst [vmem:[#allocation2 + $0x4] sm:$0x1] %v78_v4  ;;  %s341_s1 = sld [smem:[#allocation3 + $0x14]]  ;;  %s342_s26 = sld [smem:[#allocation3 + $0x15]] }
  0x3f   :  { %83 = vst [vmem:[#allocation2 + $0x5] sm:$0x1] %v82_v5  ;;  %v86_v6 = vld [vmem:[%s85_s20] sm:$0x1]  ;;  %s343_s27 = sld [smem:[#allocation3 + $0x16]]  ;;  %s344_s28 = sld [smem:[#allocation3 + $0x17]] }
  0x40   :  { %v90_v7 = vld [vmem:[%s89_s21] sm:$0x1]  ;;  %87 = vst [vmem:[#allocation2 + $0x6] sm:$0x1] %v86_v6  ;;  %s329_s29 = sld [smem:[#allocation3 + $0x8]]  ;;  %s330_s30 = sld [smem:[#allocation3 + $0x9]] }
  0x41   :  { %91 = vst [vmem:[#allocation2 + $0x7] sm:$0x1] %v90_v7  ;;  %v126_v8 = vld [vmem:[%s125_s22] sm:$0x1]  ;;  %s331_s6 = sld [smem:[#allocation3 + $0xa]]  ;;  %s543_s7 = sld [smem:[#allocation3 + $0xb]] }
  0x42   :  { %v130_v9 = vld [vmem:[%s129_s23] sm:$0x1]  ;;  %127 = vst [vmem:[#allocation2 + $0x10] sm:$0x1] %v126_v8  ;;  %s545_s8 = sld [smem:[#allocation3 + $0xc]]  ;;  %s547_s9 = sld [smem:[#allocation3 + $0xd]] }
  0x43   :  { %131 = vst [vmem:[#allocation2 + $0x11] sm:$0x1] %v130_v9  ;;  %v134_v10 = vld [vmem:[%s133_s24] sm:$0x1]  ;;  %s549_s10 = sld [smem:[#allocation3 + $0xe]]  ;;  %s551_s11 = sld [smem:[#allocation3 + $0xf]] }
  0x44   :  { %v138_v11 = vld [vmem:[%s137_s25] sm:$0x1]  ;;  %135 = vst [vmem:[#allocation2 + $0x12] sm:$0x1] %v134_v10  ;;  %s141_s2 = scalar_lea.vmem [#allocation7], %s341_s1  ;;  %s145_s12 = scalar_lea.vmem [#allocation7], %s342_s26 }
  0x45   :  { %139 = vst [vmem:[#allocation2 + $0x13] sm:$0x1] %v138_v11  ;;  %v142_v15 = vld [vmem:[%s141_s2] sm:$0x1]  ;;  %s149_s14 = scalar_lea.vmem [#allocation7], %s343_s27  ;;  %s153_s15 = scalar_lea.vmem [#allocation7], %s344_s28 }
  0x46   :  { %143 = vst [vmem:[#allocation2 + $0x14] sm:$0x1] %v142_v15  ;;  %v146_v16 = vld [vmem:[%s145_s12] sm:$0x1]  ;;  %s93_s16 = scalar_lea.vmem [#allocation7], %s329_s29  ;;  %s97_s17 = scalar_lea.vmem [#allocation7], %s330_s30 }
  0x47   :  { %v150_v17 = vld [vmem:[%s149_s14] sm:$0x1]  ;;  %147 = vst [vmem:[#allocation2 + $0x15] sm:$0x1] %v146_v16  ;;  %s101_s18 = scalar_lea.vmem [#allocation7], %s331_s6  ;;  %s105_s19 = scalar_lea.vmem [#allocation7], %s543_s7 }
  0x48   :  { %v188_v13 = vld [vmem:[#allocation2] sm:$0xff]  ;;  %151 = vst [vmem:[#allocation2 + $0x16] sm:$0x1] %v150_v17  ;;  %s109_s20 = scalar_lea.vmem [#allocation7], %s545_s8  ;;  %s113_s21 = scalar_lea.vmem [#allocation7], %s547_s9 }
  0x49   :  { %v553_v14 = vadd.f32 %v192_v12, %v188_v13  ;;  %v154_v18 = vld [vmem:[%s153_s15] sm:$0x1]  ;;  %s117_s22 = scalar_lea.vmem [#allocation7], %s549_s10  ;;  %s121_s23 = scalar_lea.vmem [#allocation7], %s551_s11 }
  0x4a   :  { %v94_v19 = vld [vmem:[%s93_s16] sm:$0x1]  ;;  %155 = vst [vmem:[#allocation2 + $0x17] sm:$0x1] %v154_v18  ;;  %s345_s24 = sld [smem:[#allocation3 + $0x18]]  ;;  %s346_s25 = sld [smem:[#allocation3 + $0x19]] }
  0x4b   :  { %202 = vadd.xlane.f32.xlu0 %v553_v14  ;;  %95 = vst [vmem:[#allocation2 + $0x8] sm:$0x1] %v94_v19  ;;  %v98_v20 = vld [vmem:[%s97_s17] sm:$0x1]  ;;  %s347_s1 = sld [smem:[#allocation3 + $0x1a]]  ;;  %s348_s26 = sld [smem:[#allocation3 + $0x1b]] }
  0x4c   :  { %v102_v21 = vld [vmem:[%s101_s18] sm:$0x1]  ;;  %99 = vst [vmem:[#allocation2 + $0x9] sm:$0x1] %v98_v20  ;;  %s349_s27 = sld [smem:[#allocation3 + $0x1c]]  ;;  %s350_s28 = sld [smem:[#allocation3 + $0x1d]] }
  0x4d   :  { %103 = vst [vmem:[#allocation2 + $0xa] sm:$0x1] %v102_v21  ;;  %v106_v22 = vld [vmem:[%s105_s19] sm:$0x1]  ;;  %s351_s29 = sld [smem:[#allocation3 + $0x1e]]  ;;  %s561_s30 = sld [smem:[#allocation3 + $0x1f]] }
  0x4e   :  { %v110_v23 = vld [vmem:[%s109_s20] sm:$0x1]  ;;  %107 = vst [vmem:[#allocation2 + $0xb] sm:$0x1] %v106_v22 }
  0x4f   :  { %111 = vst [vmem:[#allocation2 + $0xc] sm:$0x1] %v110_v23  ;;  %v114_v24 = vld [vmem:[%s113_s21] sm:$0x1] }
  0x50   :  { %v118_v25 = vld [vmem:[%s117_s22] sm:$0x1]  ;;  %115 = vst [vmem:[#allocation2 + $0xd] sm:$0x1] %v114_v24  ;;  %s157_s6 = scalar_lea.vmem [#allocation7], %s345_s24  ;;  %s161_s7 = scalar_lea.vmem [#allocation7], %s346_s25 }
  0x51   :  { %119 = vst [vmem:[#allocation2 + $0xe] sm:$0x1] %v118_v25  ;;  %v122_v26 = vld [vmem:[%s121_s23] sm:$0x1]  ;;  %v190_v28 = vld [vmem:[#allocation2 + $0x10] sm:$0xff]  ;;  %s165_s8 = scalar_lea.vmem [#allocation7], %s347_s1 }
  0x52   :  { %123 = vst [vmem:[#allocation2 + $0xf] sm:$0x1] %v122_v26  ;;  %v198_v29 = vadd.f32 %v194_v27, %v190_v28  ;;  %v158_v31 = vld [vmem:[%s157_s6] sm:$0x1]  ;;  %s169_s9 = scalar_lea.vmem [#allocation7], %s348_s26  ;;  %s173_s10 = scalar_lea.vmem [#allocation7], %s349_s27 }
  0x53   :  { %v162_v32 = vld [vmem:[%s161_s7] sm:$0x1]  ;;  %159 = vst [vmem:[#allocation2 + $0x18] sm:$0x1] %v158_v31  ;;  %s177_s11 = scalar_lea.vmem [#allocation7], %s350_s28  ;;  %s181_s2 = scalar_lea.vmem [#allocation7], %s351_s29 }
  0x54   :  { %206 = vadd.xlane.f32.xlu1 %v198_v29  ;;  %163 = vst [vmem:[#allocation2 + $0x19] sm:$0x1] %v162_v32  ;;  %v166_v34 = vld [vmem:[%s165_s8] sm:$0x1]  ;;  %s185_s12 = scalar_lea.vmem [#allocation7], %s561_s30 }
  0x55   :  { %v170_v35 = vld [vmem:[%s169_s9] sm:$0x1]  ;;  %167 = vst [vmem:[#allocation2 + $0x1a] sm:$0x1] %v166_v34 }
  0x56   :  { %171 = vst [vmem:[#allocation2 + $0x1b] sm:$0x1] %v170_v35  ;;  %v174_v37 = vld [vmem:[%s173_s10] sm:$0x1] }
  0x57   :  { %175 = vst [vmem:[#allocation2 + $0x1c] sm:$0x1] %v174_v37  ;;  %v178_v38 = vld [vmem:[%s177_s11] sm:$0x1] }
  0x58   :  { %v182_v39 = vld [vmem:[%s181_s2] sm:$0x1]  ;;  %179 = vst [vmem:[#allocation2 + $0x1d] sm:$0x1] %v178_v38 }
  0x59   :  { %v189_v33 = vld [vmem:[#allocation2 + $0x8] sm:$0xff]  ;;  %183 = vst [vmem:[#allocation2 + $0x1e] sm:$0x1] %v182_v39  ;;  %v186_v40 = vld [vmem:[%s185_s12] sm:$0x1] }
  0x5a   :  { %v197_v36 = vadd.f32 %v193_v30, %v189_v33  ;;  %187 = vst [vmem:[#allocation2 + $0x1f] sm:$0x1] %v186_v40  ;;  %v353_v4 = vld [vmem:[%s589_s3] ss:$0 sm:$0xff]  ;;  %s458_s3 = smov [#allocation10]  }
  0x5b   :  { %v354_v7 = vld [vmem:[%s590_s4] ss:$0 sm:$0xff]  ;;  %s276_s4 = sshll.u32 %s458_s3, 4  ;;  %s277_s4 = int_to_ptr.vmem [resolvable:$true] %s276_s4 }
  0x5c   :  { %204 = vadd.xlane.f32.xlu0 %v197_v36  ;;  %s423_s18 = scalar_lea.vmem %s277_s4, 512  ;;  %p428_p6 = scmp.lt.s32.totalorder %s277_s4, %s277_s4 }
  0x5d   :  { %p424_p5 = scmp.ne.s32.totalorder %s277_s4, %s423_s18  ;;  %p429_p7 = scmp.lt.s32.totalorder %s423_s18, %s423_s18 }
  0x5f   :  { %p430_p8 = por %p429_p7, %p428_p6 }
  0x61   :  { %v191_v42 = vld [vmem:[#allocation2 + $0x18] sm:$0xff]  ;;  %p431_p9 = pnand %p430_p8, %p424_p5 }
  0x62   :  { %v199_v43 = vadd.f32 %v195_v41, %v191_v42 }
  0x64   :  { %208 = vadd.xlane.f32.xlu1 %v199_v43 }
  0xd8   :  { %v203_v44 = vpop.xlane.xlu0 %202 }
  0xd9   :  { %v211_v45 = vmul.f32 0.0078125, %v203_v44 }
  0xdb   :  { %v215_v46 = vsub.f32 %v553_v14, %v211_v45 }
  0xdd   :  { %v219_v47 = vmul.f32 %v215_v46, %v215_v46 }
  0xdf   :  { %223 = vadd.xlane.f32.xlu0 %v219_v47 }
  0xe1   :  { %v207_v48 = vpop.xlane.xlu1 %206 }
  0xe2   :  { %v213_v49 = vmul.f32 0.0078125, %v207_v48 }
  0xe4   :  { %v217_v50 = vsub.f32 %v198_v29, %v213_v49 }
  0xe6   :  { %v221_v53 = vmul.f32 %v217_v50, %v217_v50 }
  0xe8   :  { %227 = vadd.xlane.f32.xlu0 %v221_v53 }
  0xe9   :  { %v205_v51 = vpop.xlane.xlu0 %204 }
  0xea   :  { %v212_v52 = vmul.f32 0.0078125, %v205_v51 }
  0xec   :  { %v216_v54 = vsub.f32 %v197_v36, %v212_v52 }
  0xee   :  { %v220_v55 = vmul.f32 %v216_v54, %v216_v54 }
  0xf0   :  { %225 = vadd.xlane.f32.xlu1 %v220_v55 }
  0xf1   :  { %v209_v56 = vpop.xlane.xlu1 %208 }
  0xf2   :  { %v214_v57 = vmul.f32 0.0078125, %v209_v56 }
  0xf4   :  { %v218_v58 = vsub.f32 %v199_v43, %v214_v57 }
  0xf6   :  { %v222_v59 = vmul.f32 %v218_v58, %v218_v58 }
  0xf8   :  { %229 = vadd.xlane.f32.xlu1 %v222_v59 }
 0x16c   :  { %v224_v60 = vpop.xlane.xlu0 %223 }
 0x16d   :  { %v231_v61 = vmul.f32 0.0078125, %v224_v60 }
 0x16f   :  { %v235_v62 = vadd.f32 1e-12, %v231_v61 }
 0x171   :  { %361 = vrsqrt.f32 %v235_v62 }
 0x175   :  { %v228_v63 = vpop.xlane.xlu0 %227 }
 0x176   :  { %v233_v0 = vmul.f32 0.0078125, %v228_v63 }
 0x178   :  { %v237_v1 = vadd.f32 1e-12, %v233_v0 }
 0x17a   :  { %363 = vrsqrt.f32 %v237_v1 }
 0x17b   :  { %v362_v2 = vpop.eup %361 }
 0x17c   :  { %v243_v6 = vmul.f32 %v362_v2, %v215_v46 }
 0x17d   :  { %v226_v3 = vpop.xlane.xlu1 %225 }
 0x17e   :  { %v232_v5 = vmul.f32 0.0078125, %v226_v3  ;;  %v253_v9 = vmul.f32 %v353_v4, %v243_v6 }
 0x180   :  { %v236_v8 = vadd.f32 1e-12, %v232_v5  ;;  %v263_v10 = vadd.f32 %v354_v7, %v253_v9 }
 0x182   :  { %365 = vrsqrt.f32 %v236_v8  ;;  %267 = vst [vmem:[#allocation10] sm:$0xff] %v263_v10 }
 0x184   :  { %v364_v11 = vpop.eup %363 }
 0x185   :  { %v230_v12 = vpop.xlane.xlu1 %229  ;;  %v245_v14 = vmul.f32 %v364_v11, %v217_v50 }
 0x186   :  { %v234_v13 = vmul.f32 0.0078125, %v230_v12 }
 0x187   :  { %v255_v16 = vmul.f32 %v353_v4, %v245_v14 }
 0x188   :  { %v238_v15 = vadd.f32 1e-12, %v234_v13 }
 0x189   :  { %v265_v19 = vadd.f32 %v354_v7, %v255_v16 }
 0x18a   :  { %367 = vrsqrt.f32 %v238_v15 }
 0x18b   :  { %269 = vst [vmem:[#allocation10 + $0x10] sm:$0xff] %v265_v19 }
 0x18c   :  { %v366_v17 = vpop.eup %365 }
 0x18d   :  { %v244_v18 = vmul.f32 %v366_v17, %v216_v54 }
 0x18f   :  { %v254_v20 = vmul.f32 %v353_v4, %v244_v18 }
 0x191   :  { %v264_v21 = vadd.f32 %v354_v7, %v254_v20 }
 0x193   :  { %268 = vst [vmem:[#allocation10 + $0x8] sm:$0xff] %v264_v21 }
 0x194   :  { %v368_v22 = vpop.eup %367 }
 0x195   :  { %v246_v23 = vmul.f32 %v368_v22, %v218_v58 }
 0x197   :  { %v256_v24 = vmul.f32 %v353_v4, %v246_v23 }
 0x199   :  { %v266_v25 = vadd.f32 %v354_v7, %v256_v24 }
 0x19b   :  { %270 = vst [vmem:[#allocation10 + $0x18] sm:$0xff] %v266_v25 }
 0x19c   :  { %434 = shalt.err (!%p431_p9)
}
 0x19d   :  { %s435_s21 = scalar_lea.hbm %s591_s5, 512 }
 0x19e   :  { %p436_p10 = scmp.ne.s32.totalorder %s591_s5, %s435_s21  ;;  %p439_p11 = scmp.lt.u32.totalorder %s435_s21, %s591_s5 }
 0x1a0   :  { %p441_p12 = pnand %p439_p11, %p436_p10 }
 0x1a2   :  { %444 = shalt.err (!%p441_p12)
}
 0x1a3   :  { %282 = dma.vmem_to_hbm [thread:$0]  %s277_s4, 512, %s591_s5, [#allocation5], %s455_s0, %s455_s0, %s456_s13  }
 0x1a4   :  { %451 = dma.done.wait [#allocation5], 512  }
 0x1a5   :  { %452 = vsyncadd [#allocation5], 4294966784 }
 0x1a6   :  { %286 = vsyncpa [#allocation4], 1 }
 0x1a7   :  { %287 = vsyncpa [#allocation9], 1 }
 0x1a8   :  { %288 = vsyncpa [#allocation5], 1 }
 0x1a9   :  { %289 = vsyncpa [#allocation6], 1 }

</bundles_post_ra>
